<compile_context>
chip_gen: v5e
topology: v5e:2x2
jax: 0.10.0
libtpu: 0.0.40
codegen_flags: <defaults>
</compile_context>

<pallas_src>
import jax
import jax.numpy as jnp
from jax.experimental import pallas as pl
from jax.experimental.pallas import tpu as pltpu


def _round_up(x, m):
    return (x + m - 1) // m * m


# --------------------------------------------------------------------------
# Fused kernel:  GAP (over flattened H*W) -> proj (C -> 1024) -> fc (1024 -> N)
# --------------------------------------------------------------------------
def _resnet_head_kernel(x_ref, pw_ref, pb_ref, fw_ref, fb_ref, o_ref):
    # x_ref : (TB, C_pad, HW)  f32   (zero-padded in batch / channel dims)
    # pw_ref: (C_pad, K_pad)   bf16  (proj weight, pre-transposed, zero-padded)
    # pb_ref: (1, K_pad)       f32
    # fw_ref: (K_pad, N_pad)   bf16  (fc weight, pre-transposed, zero-padded)
    # fb_ref: (1, N_pad)       f32
    # o_ref : (TB, N_pad)
    x = x_ref[...].astype(jnp.float32)
    pooled = jnp.mean(x, axis=-1)                         # (TB, C_pad), f32 GAP

    # proj: pooled @ W_p + b_p  (bf16 MXU inputs, f32 accumulation + epilogue)
    feat = jnp.dot(pooled.astype(jnp.bfloat16), pw_ref[...],
                   preferred_element_type=jnp.float32) + pb_ref[...]

    # fc: feat @ W_fc + b_fc  (intermediate stays on-chip, never hits HBM)
    out = jnp.dot(feat.astype(jnp.bfloat16), fw_ref[...],
                  preferred_element_type=jnp.float32) + fb_ref[...]

    o_ref[...] = out.astype(o_ref.dtype)                  # lane-dense full store


# --------------------------------------------------------------------------
# ResNet module (forward semantics: x = features(x); output = fc(x))
# --------------------------------------------------------------------------
class ResNetPallas:
    LAST_CHANNEL = 1000
    K_PAD = 1024          # LAST_CHANNEL padded up to a multiple of 128
    TB = 8                # batch tile = f32 sublane count

    def __init__(self, in_channels, num_classes, key):
        self.in_channels = in_channels
        self.num_classes = num_classes
        self.C_pad = _round_up(max(in_channels, 1), 16)
        self.N_pad = _round_up(max(num_classes, 1), 128)

        k1, k2, k3, k4 = jax.random.split(key, 4)
        # f32 master parameters, PyTorch layouts (out_features, in_features)
        self.proj_w = jax.random.normal(k1, (self.LAST_CHANNEL, in_channels),
                                        jnp.float32) * 0.02
        self.proj_b = jax.random.normal(k2, (self.LAST_CHANNEL,),
                                        jnp.float32) * 0.02
        self.fc_w = jax.random.normal(k3, (num_classes, self.LAST_CHANNEL),
                                      jnp.float32) * 0.02
        self.fc_b = jax.random.normal(k4, (num_classes,),
                                      jnp.float32) * 0.02

        # Device buffers: pre-transposed (K, N), zero-padded to 128-multiples,
        # bf16 weights / f32 biases.  Done ONCE here, not per forward call.
        self.proj_wt = (jnp.zeros((self.C_pad, self.K_PAD), jnp.bfloat16)
                        .at[:in_channels, :self.LAST_CHANNEL]
                        .set(self.proj_w.T.astype(jnp.bfloat16)))
        self.proj_b2 = (jnp.zeros((1, self.K_PAD), jnp.float32)
                        .at[0, :self.LAST_CHANNEL].set(self.proj_b))
        self.fc_wt = (jnp.zeros((self.K_PAD, self.N_pad), jnp.bfloat16)
                      .at[:self.LAST_CHANNEL, :num_classes]
                      .set(self.fc_w.T.astype(jnp.bfloat16)))
        self.fc_b2 = (jnp.zeros((1, self.N_pad), jnp.float32)
                      .at[0, :num_classes].set(self.fc_b))

    def __call__(self, x):
        B, C, H, W = x.shape
        assert C == self.in_channels
        HW = H * W
        B_pad = _round_up(B, self.TB)

        # Lane-dense GAP input: flatten spatial, zero-pad batch & channel dims.
        x_flat = x.reshape(B, C, HW)
        x_flat = jnp.pad(x_flat,
                         ((0, B_pad - B), (0, self.C_pad - C), (0, 0)))

        TB, C_pad, K_PAD, N_pad = self.TB, self.C_pad, self.K_PAD, self.N_pad

        out_p = pl.pallas_call(
            _resnet_head_kernel,
            out_shape=jax.ShapeDtypeStruct((B_pad, N_pad), x.dtype),
            grid_spec=pltpu.PrefetchScalarGridSpec(
                num_scalar_prefetch=0,
                grid=(B_pad // TB,),
                in_specs=[
                    pl.BlockSpec((TB, C_pad, HW), lambda i: (i, 0, 0)),
                    pl.BlockSpec((C_pad, K_PAD), lambda i: (0, 0)),
                    pl.BlockSpec((1, K_PAD), lambda i: (0, 0)),
                    pl.BlockSpec((K_PAD, N_pad), lambda i: (0, 0)),
                    pl.BlockSpec((1, N_pad), lambda i: (0, 0)),
                ],
                out_specs=pl.BlockSpec((TB, N_pad), lambda i: (i, 0)),
            ),
            compiler_params=pltpu.CompilerParams(
                dimension_semantics=("parallel",),
                vmem_limit_bytes=32 * 1024 * 1024,
            ),
        )(x_flat, self.proj_wt, self.proj_b2, self.fc_wt, self.fc_b2)

        # Slice off batch / class padding.
        return out_p[:B, :self.num_classes]


# --------------------------------------------------------------------------
if __name__ == "__main__":
    key = jax.random.PRNGKey(0)
    k_in, k_par = jax.random.split(key)

    B, C, H, W = 2, 4, 16, 16
    num_classes = 10

    x = jax.random.normal(k_in, (B, C, H, W), jnp.float32)

    model = ResNetPallas(in_channels=C, num_classes=num_classes, key=k_par)
    out = model(x)
    out = jax.block_until_ready(out)

    # Sanity check against a plain-JAX f32 reference of the same math.
    pooled_ref = jnp.mean(x, axis=(2, 3))
    feat_ref = pooled_ref @ model.proj_w.T + model.proj_b
    ref = feat_ref @ model.fc_w.T + model.fc_b
    assert out.shape == (B, num_classes)
    assert jnp.allclose(out, ref, atol=5e-3, rtol=5e-3), (
        float(jnp.max(jnp.abs(out - ref))))

    print("KERNEL_OK")
</pallas_src>

<mosaic_0001>
module attributes {stable_mosaic.version = 11 : i64} {
  func.func @_resnet_head_kernel(%arg0: i32, %arg1: memref<8x16x256xf32, #tpu.memory_space<vmem>>, %arg2: memref<16x1024xbf16, #tpu.memory_space<vmem>>, %arg3: memref<1x1024xf32, #tpu.memory_space<vmem>>, %arg4: memref<1024x128xbf16, #tpu.memory_space<vmem>>, %arg5: memref<1x128xf32, #tpu.memory_space<vmem>>, %arg6: memref<8x128xf32, #tpu.memory_space<vmem>>) attributes {dimension_semantics = [#tpu.dimension_semantics<parallel>], iteration_bounds = array<i64: 1>, scalar_prefetch = 0 : i64, scratch_operands = 0 : i64, tpu.core_type = #tpu.core_type<tc>, window_params = [{transform_indices = @transform_0, window_bounds = array<i64: 8, 16, 256>}, {pipeline_mode = #tpu.pipeline_mode<synchronous>, transform_indices = @transform_1, window_bounds = array<i64: 16, 1024>}, {pipeline_mode = #tpu.pipeline_mode<synchronous>, transform_indices = @transform_2, window_bounds = array<i64: 1, 1024>}, {pipeline_mode = #tpu.pipeline_mode<synchronous>, transform_indices = @transform_3, window_bounds = array<i64: 1024, 128>}, {pipeline_mode = #tpu.pipeline_mode<synchronous>, transform_indices = @transform_4, window_bounds = array<i64: 1, 128>}, {transform_indices = @transform_5, window_bounds = array<i64: 8, 128>}]} {
    %c0 = arith.constant 0 : index
    %c0_0 = arith.constant 0 : index
    %c0_1 = arith.constant 0 : index
    %0 = vector.load %arg1[%c0, %c0_0, %c0_1] : memref<8x16x256xf32, #tpu.memory_space<vmem>>, vector<8x16x256xf32>
    %cst = arith.constant dense<0.000000e+00> : vector<8x16xf32>
    %1 = vector.multi_reduction <add>, %0, %cst [2] : vector<8x16x256xf32> to vector<8x16xf32>
    %cst_2 = arith.constant 2.560000e+02 : f32
    %2 = vector.broadcast %cst_2 : f32 to vector<8x16xf32>
    %3 = arith.divf %1, %2 : vector<8x16xf32>
    %4 = arith.truncf %3 : vector<8x16xf32> to vector<8x16xbf16>
    %c0_3 = arith.constant 0 : index
    %c0_4 = arith.constant 0 : index
    %5 = vector.load %arg2[%c0_3, %c0_4] : memref<16x1024xbf16, #tpu.memory_space<vmem>>, vector<16x1024xbf16>
    %cst_5 = arith.constant dense<0.000000e+00> : vector<8x1024xf32>
    %6 = tpu.matmul %4, %5, %cst_5 {dimension_numbers = #tpu.dot_dimension_numbers<[1], [0], [0], [1], [0, 0, 1, 1], [], []>} : vector<8x16xbf16>, vector<16x1024xbf16>, vector<8x1024xf32> -> vector<8x1024xf32>
    %c0_6 = arith.constant 0 : index
    %c0_7 = arith.constant 0 : index
    %7 = vector.load %arg3[%c0_6, %c0_7] : memref<1x1024xf32, #tpu.memory_space<vmem>>, vector<1x1024xf32>
    %8 = vector.broadcast %7 : vector<1x1024xf32> to vector<8x1024xf32>
    %9 = arith.addf %6, %8 : vector<8x1024xf32>
    %10 = arith.truncf %9 : vector<8x1024xf32> to vector<8x1024xbf16>
    %c0_8 = arith.constant 0 : index
    %c0_9 = arith.constant 0 : index
    %11 = vector.load %arg4[%c0_8, %c0_9] : memref<1024x128xbf16, #tpu.memory_space<vmem>>, vector<1024x128xbf16>
    %cst_10 = arith.constant dense<0.000000e+00> : vector<8x128xf32>
    %12 = tpu.matmul %10, %11, %cst_10 {dimension_numbers = #tpu.dot_dimension_numbers<[1], [0], [0], [1], [0, 0, 1, 1], [], []>} : vector<8x1024xbf16>, vector<1024x128xbf16>, vector<8x128xf32> -> vector<8x128xf32>
    %c0_11 = arith.constant 0 : index
    %c0_12 = arith.constant 0 : index
    %13 = vector.load %arg5[%c0_11, %c0_12] : memref<1x128xf32, #tpu.memory_space<vmem>>, vector<1x128xf32>
    %14 = vector.broadcast %13 : vector<1x128xf32> to vector<8x128xf32>
    %15 = arith.addf %12, %14 : vector<8x128xf32>
    %c0_13 = arith.constant 0 : index
    %c0_14 = arith.constant 0 : index
    %16 = vector.load %arg6[%c0_13, %c0_14] : memref<8x128xf32, #tpu.memory_space<vmem>>, vector<8x128xf32>
    tpu.vector_store %arg6[%c0_13, %c0_14], %15 {strides = array<i32>} : memref<8x128xf32, #tpu.memory_space<vmem>>, vector<8x128xf32>,
    return
  }
  func.func @transform_0(%arg0: i32) -> (i32, i32, i32) {
    %c0_i32 = arith.constant 0 : i32
    %c0_i32_0 = arith.constant 0 : i32
    %c0_i32_1 = arith.constant 0 : i32
    return %arg0, %c0_i32, %c0_i32_0 : i32, i32, i32
  }
  func.func @transform_1(%arg0: i32) -> (i32, i32) {
    %c0_i32 = arith.constant 0 : i32
    %c0_i32_0 = arith.constant 0 : i32
    %c0_i32_1 = arith.constant 0 : i32
    return %c0_i32, %c0_i32_0 : i32, i32
  }
  func.func @transform_2(%arg0: i32) -> (i32, i32) {
    %c0_i32 = arith.constant 0 : i32
    %c0_i32_0 = arith.constant 0 : i32
    %c0_i32_1 = arith.constant 0 : i32
    return %c0_i32, %c0_i32_0 : i32, i32
  }
  func.func @transform_3(%arg0: i32) -> (i32, i32) {
    %c0_i32 = arith.constant 0 : i32
    %c0_i32_0 = arith.constant 0 : i32
    %c0_i32_1 = arith.constant 0 : i32
    return %c0_i32, %c0_i32_0 : i32, i32
  }
  func.func @transform_4(%arg0: i32) -> (i32, i32) {
    %c0_i32 = arith.constant 0 : i32
    %c0_i32_0 = arith.constant 0 : i32
    %c0_i32_1 = arith.constant 0 : i32
    return %c0_i32, %c0_i32_0 : i32, i32
  }
  func.func @transform_5(%arg0: i32) -> (i32, i32) {
    %c0_i32 = arith.constant 0 : i32
    %c0_i32_0 = arith.constant 0 : i32
    return %arg0, %c0_i32 : i32, i32
  }
}

</mosaic_0001>

<bundles_post_ra>
// kernel: tpu_custom_call.1
= control target key start
LH: loop header
LB: loop body
LE: loop exit
PB: predicated region body
PF: predicated region fallthrough
CT: control target
= control target key end

     0   :  { %10 = vsyncpa [#allocation3], 0  ;;  %s1710_s0 = inlined_call_operand.hbm [shape: f32[8,16,256], index: 0, kind: input, shape index: {}]   ;;  %s1711_s1 = inlined_call_operand.hbm [shape: bf16[16,1024], index: 1, kind: input, shape index: {}]   ;;  %s1712_s2 = inlined_call_operand.hbm [shape: f32[1,1024], index: 2, kind: input, shape index: {}]   ;;  %s1713_s3 = inlined_call_operand.hbm [shape: bf16[1024,128], index: 3, kind: input, shape index: {}]   ;;  %s1714_s4 = inlined_call_operand.vmem [shape: f32[1,128], index: 4, kind: input, shape index: {}]   ;;  %s1715_s5 = inlined_call_operand.hbm [shape: f32[8,128], index: 5, kind: output, shape index: {}]  }
   0x1   :  { %11 = vsyncpa [#allocation6], 0 }
   0x2   :  { %12 = vsyncpa [#allocation9], 0  ;;  %s31_s20 = sshll.u32 %s1711_s1, 4  ;;  %s32_s20 = int_to_ptr.hbm [resolvable:$true] %s31_s20 }
   0x3   :  { %13 = vsyncpa [#allocation4], 0  ;;  %s1594_s21 = smov [#allocation5]   ;;  %s18_s25 = sshll.u32 %s1710_s0, 4  ;;  %s19_s25 = int_to_ptr.hbm [resolvable:$true] %s18_s25 }
   0x4   :  { %s33_s22 = sshll.u32 %s1594_s21, 4  ;;  %s1595_s26 = smov 512   ;;  %s34_s22 = int_to_ptr.vmem [resolvable:$true] %s33_s22 }
   0x5   :  { %s1596_s27 = smov 32   ;;  %s1597_s28 = smov [#allocation2]  }
   0x6   :  { %39 = dma.hbm_to_vmem [thread:$0]  %s32_s20, 1024, %s34_s22, [#allocation6], %s1595_s26, %s1595_s26, %s1596_s27  }
   0x7   :  { %s20_s29 = sshll.u32 %s1597_s28, 4  ;;  %s1598_s30 = smov 256   ;;  %s21_s29 = int_to_ptr.vmem [resolvable:$true] %s20_s29 }
   0x8   :  { %s1599_s6 = smov 16   ;;  %s45_s8 = sshll.u32 %s1712_s2, 4  ;;  %s46_s8 = int_to_ptr.hbm [resolvable:$true] %s45_s8 }
   0x9   :  { %26 = dma.hbm_to_vmem [thread:$0]  %s19_s25, 4096, %s21_s29, [#allocation3], %s1598_s30, %s1598_s30, %s1599_s6  }
   0xa   :  { %s1600_s9 = smov [#allocation7]   ;;  %s55_s12 = sshll.u32 %s1713_s3, 4  ;;  %s56_s12 = int_to_ptr.hbm [resolvable:$true] %s55_s12 }
   0xb   :  { %s47_s10 = sshll.u32 %s1600_s9, 4  ;;  %s1601_s13 = smov [#allocation8]   ;;  %s48_s10 = int_to_ptr.vmem [resolvable:$true] %s47_s10 }
   0xc   :  { %50 = dma.hbm_to_vmem [thread:$0]  %s46_s8, 128, %s48_s10, [#allocation6]  }
   0xd   :  { %s57_s14 = sshll.u32 %s1601_s13, 4  ;;  %s1602_s15 = smov 64   ;;  %s58_s14 = int_to_ptr.vmem [resolvable:$true] %s57_s14 }
   0xe   :  { %s1603_s16 = smov 4  }
   0xf   :  { %63 = dma.hbm_to_vmem [thread:$0]  %s56_s12, 8192, %s58_s14, [#allocation9], %s1602_s15, %s1602_s15, %s1603_s16  }
  0x10   :  { %1586 = dma.done.wait [#allocation3], 4096  }
  0x11   :  { %1587 = vsyncadd [#allocation3], 4294963200 }
  0x12   :  { %1588 = dma.done.wait [#allocation6], 1152  }
  0x13   :  { %1589 = vsyncadd [#allocation6], 4294966144 }
  0x14   :  { %1590 = dma.done.wait [#allocation9], 8192  }
  0x15   :  { %1591 = vsyncadd [#allocation9], 4294959104  ;;  %v91_v0 = vld [vmem:[#allocation2 + $0x40] sm:$0xff]  ;;  %v92_v1 = vld [vmem:[#allocation2 + $0x48] sm:$0xff]  ;;  %v1604_v48 = vmov 256.0   ;;  %vm249_vm1 = vcmask 130112  }
  0x16   :  { %v87_v2 = vld [vmem:[#allocation2 + $0x20] sm:$0xff]  ;;  %v127_v3 = vadd.f32 %v92_v1, %v91_v0  ;;  %v88_v4 = vld [vmem:[#allocation2 + $0x28] sm:$0xff]  ;;  %v93_v9 = vld [vmem:[#allocation2 + $0x50] sm:$0xff]  ;;  %1464 = vrcp.f32 %v1604_v48  ;;  %vm272_vm2 = vcmask 1041409   ;;  %vm274_vm3 = vcmask 1042434   ;;  %s1605_s17 = smov [#allocation10]  }
  0x17   :  { %v83_v5 = vld [vmem:[#allocation2] sm:$0xff]  ;;  %v84_v6 = vld [vmem:[#allocation2 + $0x8] sm:$0xff]  ;;  %v121_v7 = vadd.f32 %v88_v4, %v87_v2  ;;  %v94_v10 = vld [vmem:[#allocation2 + $0x58] sm:$0xff]  ;;  %vm276_vm4 = vcmask 1043459   ;;  %vm278_vm5 = vcmask 1044484   ;;  %vm280_vm6 = vcmask 1045509  }
  0x18   :  { %v115_v8 = vadd.f32 %v84_v6, %v83_v5  ;;  %128 = vadd.xlane.f32.xlu2 %v127_v3  ;;  %v89_v11 = vld [vmem:[#allocation2 + $0x30] sm:$0xff]  ;;  %v90_v12 = vld [vmem:[#allocation2 + $0x38] sm:$0xff]  ;;  %v130_v15 = vadd.f32 %v94_v10, %v93_v9  ;;  %v99_v19 = vld [vmem:[#allocation2 + $0x80] sm:$0xff]  ;;  %v244_v6 = vlaneseq  ;;  %vm282_vm7 = vcmask 1046534   ;;  %s1071_s20 = sshll.u32 %s1715_s5, 4  ;;  %s1072_s20 = int_to_ptr.hbm [resolvable:$true] %s1071_s20 }
  0x19   :  { %122 = vadd.xlane.f32.xlu1 %v121_v7  ;;  %v85_v13 = vld [vmem:[#allocation2 + $0x10] sm:$0xff]  ;;  %v86_v14 = vld [vmem:[#allocation2 + $0x18] sm:$0xff]  ;;  %v124_v16 = vadd.f32 %v90_v12, %v89_v11  ;;  %v100_v20 = vld [vmem:[#allocation2 + $0x88] sm:$0xff]  ;;  %vm284_vm8 = vcmask 1047559   ;;  %vm327_vm9 = vcmask 130048  }
  0x1a   :  { %116 = vadd.xlane.f32.xlu0 %v115_v8  ;;  %v118_v17 = vadd.f32 %v86_v14, %v85_v13  ;;  %v97_v18 = vld [vmem:[#allocation2 + $0x70] sm:$0xff]  ;;  %v98_v21 = vld [vmem:[#allocation2 + $0x78] sm:$0xff]  ;;  %v95_v22 = vld [vmem:[#allocation2 + $0x60] sm:$0xff]  ;;  %v139_v24 = vadd.f32 %v100_v20, %v99_v19 }
  0x1b   :  { %v96_v23 = vld [vmem:[#allocation2 + $0x68] sm:$0xff]  ;;  %v136_v25 = vadd.f32 %v98_v21, %v97_v18  ;;  %v103_v27 = vld [vmem:[#allocation2 + $0xa0] sm:$0xff]  ;;  %v105_v28 = vld [vmem:[#allocation2 + $0xb0] sm:$0xff] }
  0x1c   :  { %v133_v26 = vadd.f32 %v96_v23, %v95_v22  ;;  %v106_v29 = vld [vmem:[#allocation2 + $0xb8] sm:$0xff]  ;;  %v104_v30 = vld [vmem:[#allocation2 + $0xa8] sm:$0xff]  ;;  %v101_v31 = vld [vmem:[#allocation2 + $0x90] sm:$0xff]  ;;  %v1465_v49 = vpop.eup %1464 }
  0x1d   :  { %v102_v32 = vld [vmem:[#allocation2 + $0x98] sm:$0xff]  ;;  %v148_v33 = vadd.f32 %v106_v29, %v105_v28  ;;  %v145_v34 = vadd.f32 %v104_v30, %v103_v27  ;;  %v109_v36 = vld [vmem:[#allocation2 + $0xd0] sm:$0xff]  ;;  %v111_v37 = vld [vmem:[#allocation2 + $0xe0] sm:$0xff]  ;;  %v164_v53 = vmul.f32 256.0, %v1465_v49  ;;  %vm168_vm0 = vweird.f32 %v1465_v49 }
  0x1e   :  { %v142_v35 = vadd.f32 %v102_v32, %v101_v31  ;;  %v112_v38 = vld [vmem:[#allocation2 + $0xe8] sm:$0xff]  ;;  %v110_v39 = vld [vmem:[#allocation2 + $0xd8] sm:$0xff]  ;;  %v107_v40 = vld [vmem:[#allocation2 + $0xc0] sm:$0xff] }
  0x1f   :  { %v108_v41 = vld [vmem:[#allocation2 + $0xc8] sm:$0xff]  ;;  %v157_v42 = vadd.f32 %v112_v38, %v111_v37  ;;  %v154_v43 = vadd.f32 %v110_v39, %v109_v36  ;;  %v113_v45 = vld [vmem:[#allocation2 + $0xf0] sm:$0xff]  ;;  %v114_v46 = vld [vmem:[#allocation2 + $0xf8] sm:$0xff]  ;;  %v165_v54 = vsub.f32 1.0, %v164_v53 }
  0x20   :  { %131 = vadd.xlane.f32.xlu2 %v130_v15  ;;  %v151_v44 = vadd.f32 %v108_v41, %v107_v40  ;;  %v160_v47 = vadd.f32 %v114_v46, %v113_v45  ;;  %v1085_v61 = vld [vmem:[#allocation5] sm:$0xf]  ;;  %v1379_v63 = vld [vmem:[#allocation5 + $0x4] sm:$0xf]  ;;  %v1093_v4 = vld [vmem:[#allocation5 + $0x8] sm:$0xf] }
  0x21   :  { %125 = vadd.xlane.f32.xlu1 %v124_v16  ;;  %v166_v58 = vmul.f32 %v1465_v49, %v165_v54  ;;  %v1383_v62 = vld [vmem:[#allocation5 + $0x1c] sm:$0xf0]  ;;  %v1087_v3 = vld [vmem:[#allocation5 + $0x20] sm:$0xf0]  ;;  %v1384_v5 = vld [vmem:[#allocation5 + $0x24] sm:$0xf0] }
  0x22   :  { %119 = vadd.xlane.f32.xlu0 %v118_v17  ;;  %v1086_v2 = vor.u32 %v1383_v62, %v1085_v61  ;;  %v1380_v7 = vld [vmem:[#allocation5 + $0xc] sm:$0xf]  ;;  %v1090_v10 = vor.u32 %v1379_v63, %v1087_v3  ;;  %v1094_v11 = vor.u32 %v1384_v5, %v1093_v4  ;;  %v1654_v17 = vand.u32 127, %v244_v6  ;;  %v1109_v19 = vld [vmem:[#allocation5 + $0x18] sm:$0xf] }
  0x23   :  { %v167_v59 = vadd.f32 %v1465_v49, %v166_v58  ;;  %v1095_v8 = vld [vmem:[#allocation5 + $0x28] sm:$0xf0]  ;;  %v1386_v20 = vld [vmem:[#allocation5 + $0x34] sm:$0xf0]  ;;  %v1382_v21 = vld [vmem:[#allocation5 + $0x1c] sm:$0xf] }
  0x24   :  { %338 = vmatpush.bf16.msra.mxu0 %v1086_v2  ;;  %v1098_v12 = vor.u32 %v1380_v7, %v1095_v8  ;;  %351 = vmatpush.bf16.msra.mxu1 %v1090_v10  ;;  %v1101_v27 = vld [vmem:[#allocation5 + $0x10] sm:$0xf]  ;;  %v1103_v36 = vld [vmem:[#allocation5 + $0x30] sm:$0xf0]  ;;  %v1663_v41 = vadd.s32 4294967288, %v1654_v17 }
  0x25   :  { %v1648_v9 = vsel %vm168_vm0, %v1465_v49, %v167_v59  ;;  %364 = vmatpush.bf16.msra.mxu2 %v1094_v11  ;;  %v1385_v28 = vld [vmem:[#allocation5 + $0x2c] sm:$0xf0] }
  0x26   :  { %377 = vmatpush.bf16.msra.mxu3 %v1098_v12 }
  0x28   :  { %140 = vadd.xlane.f32.xlu2 %v139_v24 }
  0x29   :  { %137 = vadd.xlane.f32.xlu1 %v136_v25  ;;  %v1110_v25 = vor.u32 %v1386_v20, %v1109_v19 }
  0x2a   :  { %134 = vadd.xlane.f32.xlu0 %v133_v26  ;;  %v1111_v26 = vld [vmem:[#allocation5 + $0x38] sm:$0xf0] }
  0x2b   :  { %416 = vmatpush.bf16.msrb.mxu2 %v1110_v25 }
  0x30   :  { %149 = vadd.xlane.f32.xlu2 %v148_v33  ;;  %v1114_v33 = vor.u32 %v1382_v21, %v1111_v26 }
  0x31   :  { %146 = vadd.xlane.f32.xlu1 %v145_v34  ;;  %v1102_v34 = vor.u32 %v1385_v28, %v1101_v27 }
  0x32   :  { %143 = vadd.xlane.f32.xlu0 %v142_v35  ;;  %v1381_v35 = vld [vmem:[#allocation5 + $0x14] sm:$0xf]  ;;  %429 = vmatpush.bf16.msrb.mxu3 %v1114_v33 }
  0x33   :  { %v1106_v37 = vor.u32 %v1381_v35, %v1103_v36  ;;  %390 = vmatpush.bf16.msrb.mxu0 %v1102_v34 }
  0x35   :  { %403 = vmatpush.bf16.msrb.mxu1 %v1106_v37 }
  0x38   :  { %158 = vadd.xlane.f32.xlu2 %v157_v42 }
  0x39   :  { %155 = vadd.xlane.f32.xlu1 %v154_v43 }
  0x3a   :  { %152 = vadd.xlane.f32.xlu0 %v151_v44 }
  0x42   :  { %161 = vadd.xlane.f32.xlu0 %v160_v47 }
  0x8b   :  { %v129_v50 = vpop.xlane.xlu2 %128 }
  0x8c   :  { %v123_v51 = vpop.xlane.xlu1 %122  ;;  %v174_v18 = vmul.f32 %v1648_v9, %v129_v50 }
  0x8d   :  { %v117_v52 = vpop.xlane.xlu0 %116  ;;  %v172_v13 = vmul.f32 %v1648_v9, %v123_v51 }
  0x8e   :  { %v170_v16 = vmul.f32 %v1648_v9, %v117_v52 }
  0x93   :  { %v132_v55 = vpop.xlane.xlu2 %131 }
  0x94   :  { %v126_v56 = vpop.xlane.xlu1 %125  ;;  %v175_v22 = vmul.f32 %v1648_v9, %v132_v55 }
  0x95   :  { %v120_v57 = vpop.xlane.xlu0 %119  ;;  %v173_v14 = vmul.f32 %v1648_v9, %v126_v56 }
  0x96   :  { %v171_v15 = vmul.f32 %v1648_v9, %v120_v57  ;;  %v188_v42 = vpack.c.bf16 %v175_v22, %v174_v18 }
  0x97   :  { %v187_v23 = vpack.c.bf16 %v173_v14, %v172_v13 }
  0x98   :  { %v186_v24 = vpack.c.bf16 %v171_v15, %v170_v16  ;;  %v232_v51 = vunpack.c.l.b16 %v188_v42  ;;  %v233_v52 = vunpack.c.h.b16 %v188_v42 }
  0x99   :  { %v230_v43 = vunpack.c.l.b16 %v187_v23  ;;  %v231_v44 = vunpack.c.h.b16 %v187_v23 }
  0x9a   :  { %v228_v45 = vunpack.c.l.b16 %v186_v24  ;;  %v229_v46 = vunpack.c.h.b16 %v186_v24  ;;  %v254_v3 = vperm.slane %v232_v51, %v1654_v17  ;;  %v255_v4 = vperm.slane %v233_v52, %v1663_v41  ;;  %v1400_v51 = vld [vmem:[#allocation8 + $0x68] sm:$0xff] }
  0x9b   :  { %v141_v60 = vpop.xlane.xlu2 %140  ;;  %v251_v53 = vperm.slane %v230_v43, %v1654_v17  ;;  %v252_v54 = vperm.slane %v231_v44, %v1663_v41  ;;  %v1394_v44 = vld [vmem:[#allocation8 + $0x38] sm:$0xff]  ;;  %v1408_v52 = vld [vmem:[#allocation8 + $0xa8] sm:$0xff] }
  0x9c   :  { %v138_v0 = vpop.xlane.xlu1 %137  ;;  %v178_v38 = vmul.f32 %v1648_v9, %v141_v60  ;;  %v246_v55 = vperm.slane %v228_v45, %v1654_v17  ;;  %v248_v56 = vperm.slane %v229_v46, %v1663_v41  ;;  %v256_v19 = vsel %vm249_vm1, %v255_v4, %v254_v3  ;;  %v1402_v45 = vld [vmem:[#allocation8 + $0x78] sm:$0xff]  ;;  %v1396_v3 = vld [vmem:[#allocation8 + $0x48] sm:$0xff] }
  0x9d   :  { %v135_v1 = vpop.xlane.xlu0 %134  ;;  %v177_v29 = vmul.f32 %v1648_v9, %v138_v0  ;;  %v253_v5 = vsel %vm249_vm1, %v252_v54, %v251_v53  ;;  %v1410_v46 = vld [vmem:[#allocation8 + $0xb8] sm:$0xff]  ;;  %v1416_v53 = vld [vmem:[#allocation8 + $0xe8] sm:$0xff]  ;;  %v1391_v54 = vld [vmem:[#allocation8 + $0x20] sm:$0xff] }
  0x9e   :  { %v176_v30 = vmul.f32 %v1648_v9, %v135_v1  ;;  %v250_v6 = vsel %vm249_vm1, %v248_v56, %v246_v55  ;;  %v1399_v55 = vld [vmem:[#allocation8 + $0x60] sm:$0xff]  ;;  %v1404_v4 = vld [vmem:[#allocation8 + $0x88] sm:$0xff] }
  0x9f   :  { %v273_v20 = vsel %vm272_vm2, %v253_v5, %v250_v6  ;;  %v1407_v56 = vld [vmem:[#allocation8 + $0xa0] sm:$0xff]  ;;  %v1412_v5 = vld [vmem:[#allocation8 + $0xc8] sm:$0xff] }
  0xa0   :  { %v189_v47 = vpack.c.bf16 %v177_v29, %v176_v30  ;;  %v275_v29 = vsel %vm274_vm3, %v256_v19, %v273_v20  ;;  %v1387_v6 = vld [vmem:[#allocation8] sm:$0xff]  ;;  %v1432_v19 = vld [vmem:[#allocation8 + $0x168] sm:$0xff]  ;;  %v1441_v20 = vld [vmem:[#allocation8 + $0x1b0] sm:$0xff] }
  0xa2   :  { %v234_v57 = vunpack.c.l.b16 %v189_v47  ;;  %v235_v60 = vunpack.c.h.b16 %v189_v47  ;;  %v1418_v47 = vld [vmem:[#allocation8 + $0xf8] sm:$0xff] }
  0xa3   :  { %v150_v40 = vpop.xlane.xlu2 %149 }
  0xa4   :  { %v147_v31 = vpop.xlane.xlu1 %146  ;;  %v181_v49 = vmul.f32 %v1648_v9, %v150_v40  ;;  %v257_v8 = vperm.slane %v234_v57, %v1654_v17  ;;  %v258_v10 = vperm.slane %v235_v60, %v1663_v41  ;;  %v1415_v57 = vld [vmem:[#allocation8 + $0xe0] sm:$0xff]  ;;  %v1406_v60 = vld [vmem:[#allocation8 + $0x98] sm:$0xff] }
  0xa5   :  { %v144_v32 = vpop.xlane.xlu0 %143  ;;  %v180_v48 = vmul.f32 %v1648_v9, %v147_v31 }
  0xa6   :  { %v179_v39 = vmul.f32 %v1648_v9, %v144_v32  ;;  %v259_v22 = vsel %vm249_vm1, %v258_v10, %v257_v8  ;;  %v1426_v8 = vld [vmem:[#allocation8 + $0x138] sm:$0xff] }
  0xa7   :  { %v191_v61 = vpack.c.bf16 %v181_v49, %v180_v48  ;;  %v277_v31 = vsel %vm276_vm4, %v259_v22, %v275_v29  ;;  %v1409_v48 = vld [vmem:[#allocation8 + $0xb0] sm:$0xff]  ;;  %v1434_v10 = vld [vmem:[#allocation8 + $0x178] sm:$0xff]  ;;  %v1423_v22 = vld [vmem:[#allocation8 + $0x120] sm:$0xff] }
  0xa8   :  { %v190_v50 = vpack.c.bf16 %v179_v39, %v178_v38  ;;  %v1417_v49 = vld [vmem:[#allocation8 + $0xf0] sm:$0xff]  ;;  %v1447_v29 = vld [vmem:[#allocation8 + $0x1e0] sm:$0xff] }
  0xa9   :  { %v238_v11 = vunpack.c.l.b16 %v191_v61  ;;  %v239_v12 = vunpack.c.h.b16 %v191_v61  ;;  %v1414_v61 = vld [vmem:[#allocation8 + $0xd8] sm:$0xff] }
  0xaa   :  { %v236_v0 = vunpack.c.l.b16 %v190_v50  ;;  %v237_v1 = vunpack.c.h.b16 %v190_v50  ;;  %v1392_v50 = vld [vmem:[#allocation8 + $0x28] sm:$0xff] }
  0xab   :  { %v159_v7 = vpop.xlane.xlu2 %158  ;;  %v263_v23 = vperm.slane %v238_v11, %v1654_v17  ;;  %v264_v24 = vperm.slane %v239_v12, %v1663_v41  ;;  %v1403_v11 = vld [vmem:[#allocation8 + $0x80] sm:$0xff] }
  0xac   :  { %v156_v58 = vpop.xlane.xlu1 %155  ;;  %v260_v13 = vperm.slane %v236_v0, %v1654_v17  ;;  %v261_v14 = vperm.slane %v237_v1, %v1663_v41  ;;  %v184_v18 = vmul.f32 %v1648_v9, %v159_v7  ;;  %v1405_v0 = vld [vmem:[#allocation8 + $0x90] sm:$0xff]  ;;  %v1395_v7 = vld [vmem:[#allocation8 + $0x40] sm:$0xff] }
  0xad   :  { %v153_v59 = vpop.xlane.xlu0 %152  ;;  %v183_v62 = vmul.f32 %v1648_v9, %v156_v58  ;;  %v265_v33 = vsel %vm249_vm1, %v264_v24, %v263_v23  ;;  %v1390_v58 = vld [vmem:[#allocation8 + $0x18] sm:$0xff]  ;;  %v1413_v1 = vld [vmem:[#allocation8 + $0xd0] sm:$0xff]  ;;  %v1411_v12 = vld [vmem:[#allocation8 + $0xc0] sm:$0xff] }
  0xae   :  { %v182_v63 = vmul.f32 %v1648_v9, %v153_v59  ;;  %v262_v26 = vsel %vm249_vm1, %v261_v14, %v260_v13  ;;  %v1398_v59 = vld [vmem:[#allocation8 + $0x58] sm:$0xff]  ;;  %v1431_v23 = vld [vmem:[#allocation8 + $0x160] sm:$0xff]  ;;  %v1440_v24 = vld [vmem:[#allocation8 + $0x1a8] sm:$0xff] }
  0xaf   :  { %v279_v32 = vsel %vm278_vm5, %v262_v26, %v277_v31  ;;  %v1442_v13 = vld [vmem:[#allocation8 + $0x1b8] sm:$0xff]  ;;  %v1429_v31 = vld [vmem:[#allocation8 + $0x150] sm:$0xff] }
  0xb0   :  { %v192_v2 = vpack.c.bf16 %v183_v62, %v182_v63  ;;  %v281_v38 = vsel %vm280_vm6, %v265_v33, %v279_v32  ;;  %v1389_v62 = vld [vmem:[#allocation8 + $0x10] sm:$0xff]  ;;  %v1450_v14 = vld [vmem:[#allocation8 + $0x1f8] sm:$0xff] }
  0xb1   :  { %v1397_v63 = vld [vmem:[#allocation8 + $0x50] sm:$0xff]  ;;  %v1422_v26 = vld [vmem:[#allocation8 + $0x118] sm:$0xff] }
  0xb2   :  { %v240_v15 = vunpack.c.l.b16 %v192_v2  ;;  %v241_v16 = vunpack.c.h.b16 %v192_v2  ;;  %v1388_v2 = vld [vmem:[#allocation8 + $0x8] sm:$0xff]  ;;  %v1438_v32 = vld [vmem:[#allocation8 + $0x198] sm:$0xff] }
  0xb3   :  { %v1446_v33 = vld [vmem:[#allocation8 + $0x1d8] sm:$0xff] }
  0xb4   :  { %v266_v27 = vperm.slane %v240_v15, %v1654_v17  ;;  %v267_v28 = vperm.slane %v241_v16, %v1663_v41  ;;  %v1425_v15 = vld [vmem:[#allocation8 + $0x130] sm:$0xff] }
  0xb5   :  { %v162_v21 = vpop.xlane.xlu0 %161  ;;  %v1433_v16 = vld [vmem:[#allocation8 + $0x170] sm:$0xff] }
  0xb6   :  { %v185_v25 = vmul.f32 %v1648_v9, %v162_v21  ;;  %v268_v36 = vsel %vm249_vm1, %v267_v28, %v266_v27  ;;  %v1449_v21 = vld [vmem:[#allocation8 + $0x1f0] sm:$0xff]  ;;  %v1430_v27 = vld [vmem:[#allocation8 + $0x158] sm:$0xff]  ;;  %v1439_v28 = vld [vmem:[#allocation8 + $0x1a0] sm:$0xff] }
  0xb7   :  { %v283_v39 = vsel %vm282_vm7, %v268_v36, %v281_v38  ;;  %v1437_v36 = vld [vmem:[#allocation8 + $0x190] sm:$0xff]  ;;  %v1427_v38 = vld [vmem:[#allocation8 + $0x140] sm:$0xff] }
  0xb8   :  { %v193_v30 = vpack.c.bf16 %v185_v25, %v184_v18  ;;  %v1424_v18 = vld [vmem:[#allocation8 + $0x128] sm:$0xff] }
  0xb9   :  { %v1448_v25 = vld [vmem:[#allocation8 + $0x1e8] sm:$0xff] }
  0xba   :  { %v242_v34 = vunpack.c.l.b16 %v193_v30  ;;  %v243_v35 = vunpack.c.h.b16 %v193_v30  ;;  %v1421_v30 = vld [vmem:[#allocation8 + $0x110] sm:$0xff] }
  0xbc   :  { %v269_v9 = vperm.slane %v242_v34, %v1654_v17  ;;  %v270_v37 = vperm.slane %v243_v35, %v1663_v41  ;;  %v1393_v17 = vld [vmem:[#allocation8 + $0x30] sm:$0xff]  ;;  %v1420_v34 = vld [vmem:[#allocation8 + $0x108] sm:$0xff] }
  0xbd   :  { %v1401_v41 = vld [vmem:[#allocation8 + $0x70] sm:$0xff]  ;;  %v1428_v35 = vld [vmem:[#allocation8 + $0x148] sm:$0xff] }
  0xbe   :  { %v271_v40 = vsel %vm249_vm1, %v270_v37, %v269_v9  ;;  %v1445_v9 = vld [vmem:[#allocation8 + $0x1d0] sm:$0xff]  ;;  %v1419_v37 = vld [vmem:[#allocation8 + $0x100] sm:$0xff] }
  0xbf   :  { %v285_v42 = vsel %vm284_vm8, %v271_v40, %v283_v39  ;;  %v1436_v39 = vld [vmem:[#allocation8 + $0x188] sm:$0xff] }
  0xc0   :  { %v286_v43 = vpack.c.b16 %v285_v42, %v285_v42  ;;  %v1444_v40 = vld [vmem:[#allocation8 + $0x1c8] sm:$0xff]  ;;  %v1435_v42 = vld [vmem:[#allocation8 + $0x180] sm:$0xff] }
  0xc2   :  { %1115 = vmatmul.msk.bf16.vlgmr.msra.gmra.mxu0 %vm327_vm9, %v286_v43  ;;  %1116 = vmatmul.msk.bf16.vlgmr.msra.gmra.mxu1 %vm327_vm9, %v286_v43 }
  0xc3   :  { %1117 = vmatmul.msk.bf16.vlgmr.msra.gmra.mxu2 %vm327_vm9, %v286_v43  ;;  %1118 = vmatmul.msk.bf16.vlgmr.msra.gmra.mxu3 %vm327_vm9, %v286_v43 }
  0xc4   :  { %959 = vmatpush.bf16.msra.mxu0 %v1394_v44  ;;  %972 = vmatpush.bf16.msra.mxu1 %v1402_v45  ;;  %v202_v44 = vld [vmem:[#allocation7] sm:$0xff] }
  0xc5   :  { %985 = vmatpush.bf16.msra.mxu2 %v1410_v46  ;;  %998 = vmatpush.bf16.msra.mxu3 %v1418_v47  ;;  %v204_v45 = vperm.slane %v202_v44, 0  ;;  %v205_v46 = vperm.slane %v202_v44, 1 }
  0xc8   :  { %960 = vmatpush.bf16.msra.mxu0 %v1393_v17  ;;  %973 = vmatpush.bf16.msra.mxu1 %v1401_v41 }
  0xc9   :  { %986 = vmatpush.bf16.msra.mxu2 %v1409_v48  ;;  %999 = vmatpush.bf16.msra.mxu3 %v1417_v49 }
  0xcc   :  { %961 = vmatpush.bf16.msra.mxu0 %v1392_v50  ;;  %974 = vmatpush.bf16.msra.mxu1 %v1400_v51  ;;  %v206_v51 = vperm.slane %v202_v44, 2 }
  0xcd   :  { %987 = vmatpush.bf16.msra.mxu2 %v1408_v52  ;;  %1000 = vmatpush.bf16.msra.mxu3 %v1416_v53  ;;  %v207_v52 = vperm.slane %v202_v44, 3 }
  0xd0   :  { %962 = vmatpush.bf16.msra.mxu0 %v1391_v54  ;;  %975 = vmatpush.bf16.msra.mxu1 %v1399_v55 }
  0xd1   :  { %988 = vmatpush.bf16.msra.mxu2 %v1407_v56  ;;  %1001 = vmatpush.bf16.msra.mxu3 %v1415_v57 }
  0xd2   :  { %1119 = vmatmul.msk.bf16.vlgmr.msrb.gmra.mxu0 %vm327_vm9, %v286_v43  ;;  %1120 = vmatmul.msk.bf16.vlgmr.msrb.gmra.mxu1 %vm327_vm9, %v286_v43 }
  0xd3   :  { %1121 = vmatmul.msk.bf16.vlgmr.msrb.gmra.mxu2 %vm327_vm9, %v286_v43  ;;  %1122 = vmatmul.msk.bf16.vlgmr.msrb.gmra.mxu3 %vm327_vm9, %v286_v43  ;;  %v1443_v43 = vld [vmem:[#allocation8 + $0x1c0] sm:$0xff] }
  0xd4   :  { %963 = vmatpush.bf16.msra.mxu0 %v1390_v58  ;;  %976 = vmatpush.bf16.msra.mxu1 %v1398_v59 }
  0xd5   :  { %989 = vmatpush.bf16.msra.mxu2 %v1406_v60  ;;  %1002 = vmatpush.bf16.msra.mxu3 %v1414_v61  ;;  %v208_v61 = vperm.slane %v202_v44, 4 }
  0xd8   :  { %964 = vmatpush.bf16.msra.mxu0 %v1389_v62  ;;  %977 = vmatpush.bf16.msra.mxu1 %v1397_v63  ;;  %v209_v62 = vperm.slane %v202_v44, 5 }
  0xd9   :  { %990 = vmatpush.bf16.msra.mxu2 %v1405_v0  ;;  %1003 = vmatpush.bf16.msra.mxu3 %v1413_v1 }
  0xdc   :  { %965 = vmatpush.bf16.msra.mxu0 %v1388_v2  ;;  %978 = vmatpush.bf16.msra.mxu1 %v1396_v3 }
  0xdd   :  { %991 = vmatpush.bf16.msra.mxu2 %v1404_v4  ;;  %1004 = vmatpush.bf16.msra.mxu3 %v1412_v5 }
  0xe0   :  { %966 = vmatpush.bf16.msra.mxu0 %v1387_v6  ;;  %979 = vmatpush.bf16.msra.mxu1 %v1395_v7  ;;  %v210_v7 = vperm.slane %v202_v44, 6 }
  0xe1   :  { %992 = vmatpush.bf16.msra.mxu2 %v1403_v11  ;;  %1005 = vmatpush.bf16.msra.mxu3 %v1411_v12 }
  0xe4   :  { %1011 = vmatpush.bf16.msrb.mxu0 %v1426_v8  ;;  %1024 = vmatpush.bf16.msrb.mxu1 %v1434_v10  ;;  %v211_v8 = vperm.slane %v202_v44, 7 }
  0xe5   :  { %1037 = vmatpush.bf16.msrb.mxu2 %v1442_v13  ;;  %1050 = vmatpush.bf16.msrb.mxu3 %v1450_v14 }
  0xe8   :  { %1012 = vmatpush.bf16.msrb.mxu0 %v1425_v15  ;;  %1025 = vmatpush.bf16.msrb.mxu1 %v1433_v16 }
  0xe9   :  { %1038 = vmatpush.bf16.msrb.mxu2 %v1441_v20  ;;  %1051 = vmatpush.bf16.msrb.mxu3 %v1449_v21 }
  0xec   :  { %1013 = vmatpush.bf16.msrb.mxu0 %v1424_v18  ;;  %1026 = vmatpush.bf16.msrb.mxu1 %v1432_v19 }
  0xed   :  { %1039 = vmatpush.bf16.msrb.mxu2 %v1440_v24  ;;  %1052 = vmatpush.bf16.msrb.mxu3 %v1448_v25 }
  0xf0   :  { %1014 = vmatpush.bf16.msrb.mxu0 %v1423_v22  ;;  %1027 = vmatpush.bf16.msrb.mxu1 %v1431_v23  ;;  %v1463_v23 = vld [vmem:[%s1714_s4] ss:$0 sm:$0xff]  ;;  %s1069_s4 = sshll.u32 %s1605_s17, 4  ;;  %s1070_s4 = int_to_ptr.vmem [resolvable:$true] %s1069_s4 }
  0xf1   :  { %1040 = vmatpush.bf16.msrb.mxu2 %v1439_v28  ;;  %1053 = vmatpush.bf16.msrb.mxu3 %v1447_v29 }
  0xf4   :  { %1015 = vmatpush.bf16.msrb.mxu0 %v1422_v26  ;;  %1028 = vmatpush.bf16.msrb.mxu1 %v1430_v27 }
  0xf5   :  { %1041 = vmatpush.bf16.msrb.mxu2 %v1438_v32  ;;  %1054 = vmatpush.bf16.msrb.mxu3 %v1446_v33 }
  0xf8   :  { %1016 = vmatpush.bf16.msrb.mxu0 %v1421_v30  ;;  %1029 = vmatpush.bf16.msrb.mxu1 %v1429_v31 }
  0xf9   :  { %1042 = vmatpush.bf16.msrb.mxu2 %v1437_v36  ;;  %1055 = vmatpush.bf16.msrb.mxu3 %v1445_v9 }
  0xfc   :  { %1017 = vmatpush.bf16.msrb.mxu0 %v1420_v34  ;;  %1030 = vmatpush.bf16.msrb.mxu1 %v1428_v35 }
  0xfd   :  { %1043 = vmatpush.bf16.msrb.mxu2 %v1436_v39  ;;  %1056 = vmatpush.bf16.msrb.mxu3 %v1444_v40 }
 0x100   :  { %1018 = vmatpush.bf16.msrb.mxu0 %v1419_v37  ;;  %1031 = vmatpush.bf16.msrb.mxu1 %v1427_v38 }
 0x101   :  { %1044 = vmatpush.bf16.msrb.mxu2 %v1435_v42  ;;  %1057 = vmatpush.bf16.msrb.mxu3 %v1443_v43 }
 0x13f   :  { %v340_v47 = vpop.f32.mrf.mxu0  ;;  %v353_v17 = vpop.f32.mrf.mxu1 }
 0x140   :  { %v341_v41 = vadd.f32 %v340_v47, %v204_v45  ;;  %v354_v48 = vadd.f32 %v353_v17, %v205_v46 }
 0x142   :  { %v435_v49 = vpack.c.bf16 %v341_v41, %v341_v41  ;;  %v436_v50 = vpack.c.bf16 %v354_v48, %v354_v48 }
 0x144   :  { %967 = vmatmul.bf16.vlgmr.msra.gmra.mxu0 %v435_v49  ;;  %980 = vmatmul.bf16.vlgmr.msra.gmra.mxu1 %v436_v50 }
 0x146   :  { %v366_v53 = vpop.f32.mrf.mxu2  ;;  %v379_v54 = vpop.f32.mrf.mxu3 }
 0x147   :  { %v367_v55 = vadd.f32 %v366_v53, %v206_v51  ;;  %v380_v56 = vadd.f32 %v379_v54, %v207_v52  ;;  %v342_v57 = vpop.f32.mrf.mxu0  ;;  %v355_v58 = vpop.f32.mrf.mxu1 }
 0x149   :  { %v437_v59 = vpack.c.bf16 %v367_v55, %v367_v55  ;;  %v438_v60 = vpack.c.bf16 %v380_v56, %v380_v56 }
 0x14b   :  { %993 = vmatmul.bf16.vlgmr.msra.gmra.mxu2 %v437_v59  ;;  %1006 = vmatmul.bf16.vlgmr.msra.gmra.mxu3 %v438_v60 }
 0x14e   :  { %v368_v63 = vpop.f32.mrf.mxu2  ;;  %v381_v0 = vpop.f32.mrf.mxu3 }
 0x14f   :  { %v392_v1 = vpop.f32.mrf.mxu0  ;;  %v405_v2 = vpop.f32.mrf.mxu1 }
 0x150   :  { %v393_v3 = vadd.f32 %v392_v1, %v208_v61  ;;  %v406_v4 = vadd.f32 %v405_v2, %v209_v62 }
 0x152   :  { %v439_v5 = vpack.c.bf16 %v393_v3, %v393_v3  ;;  %v440_v6 = vpack.c.bf16 %v406_v4, %v406_v4 }
 0x154   :  { %1019 = vmatmul.bf16.vlgmr.msrb.gmra.mxu0 %v439_v5  ;;  %1032 = vmatmul.bf16.vlgmr.msrb.gmra.mxu1 %v440_v6 }
 0x156   :  { %v418_v10 = vpop.f32.mrf.mxu2  ;;  %v431_v11 = vpop.f32.mrf.mxu3 }
 0x157   :  { %v419_v12 = vadd.f32 %v418_v10, %v210_v7  ;;  %v432_v13 = vadd.f32 %v431_v11, %v211_v8  ;;  %v394_v14 = vpop.f32.mrf.mxu0  ;;  %v407_v15 = vpop.f32.mrf.mxu1 }
 0x159   :  { %v441_v16 = vpack.c.bf16 %v419_v12, %v419_v12  ;;  %v442_v18 = vpack.c.bf16 %v432_v13, %v432_v13 }
 0x15b   :  { %1045 = vmatmul.bf16.vlgmr.msrb.gmra.mxu2 %v441_v16  ;;  %1058 = vmatmul.bf16.vlgmr.msrb.gmra.mxu3 %v442_v18 }
 0x15e   :  { %v420_v19 = vpop.f32.mrf.mxu2  ;;  %v433_v20 = vpop.f32.mrf.mxu3 }
 0x1c1   :  { %v968_v21 = vpop.f32.mrf.mxu0  ;;  %v981_v22 = vpop.f32.mrf.mxu1 }
 0x1c2   :  { %v969_v26 = vadd.f32 %v1463_v23, %v968_v21 }
 0x1c4   :  { %v982_v29 = vadd.f32 %v981_v22, %v969_v26 }
 0x1c9   :  { %v970_v24 = vpop.f32.mrf.mxu0  ;;  %v983_v25 = vpop.f32.mrf.mxu1 }
 0x1ce   :  { %v994_v27 = vpop.f32.mrf.mxu2  ;;  %v1007_v28 = vpop.f32.mrf.mxu3 }
 0x1cf   :  { %v995_v30 = vadd.f32 %v994_v27, %v982_v29 }
 0x1d1   :  { %v1020_v31 = vpop.f32.mrf.mxu0  ;;  %v1033_v32 = vpop.f32.mrf.mxu1  ;;  %v1008_v33 = vadd.f32 %v1007_v28, %v995_v30 }
 0x1d3   :  { %v1021_v36 = vadd.f32 %v1020_v31, %v1008_v33 }
 0x1d5   :  { %v1034_v38 = vadd.f32 %v1033_v32, %v1021_v36 }
 0x1d6   :  { %v996_v34 = vpop.f32.mrf.mxu2  ;;  %v1009_v35 = vpop.f32.mrf.mxu3 }
 0x1d9   :  { %v1022_v9 = vpop.f32.mrf.mxu0  ;;  %v1035_v37 = vpop.f32.mrf.mxu1 }
 0x1de   :  { %v1046_v39 = vpop.f32.mrf.mxu2  ;;  %v1059_v40 = vpop.f32.mrf.mxu3 }
 0x1df   :  { %v1047_v42 = vadd.f32 %v1046_v39, %v1034_v38 }
 0x1e1   :  { %v1060_v43 = vadd.f32 %v1059_v40, %v1047_v42 }
 0x1e3   :  { %1063 = vst [vmem:[#allocation10] sm:$0xff] %v1060_v43 }
 0x1e4   :  { %1074 = dma.vmem_to_hbm [thread:$0]  %s1070_s4, 128, %s1072_s20, [#allocation4]  }
 0x1e6   :  { %v1048_v44 = vpop.f32.mrf.mxu2  ;;  %v1061_v45 = vpop.f32.mrf.mxu3 }
 0x1e7   :  { %1592 = dma.done.wait [#allocation4], 128  }
 0x1e8   :  { %1593 = vsyncadd [#allocation4], 4294967168 }
 0x1e9   :  { %1079 = vsyncpa [#allocation3], 1 }
 0x1ea   :  { %1080 = vsyncpa [#allocation6], 1 }
 0x1eb   :  { %1081 = vsyncpa [#allocation9], 1 }
 0x1ec   :  { %1082 = vsyncpa [#allocation4], 1 }

</bundles_post_ra>
